<compile_context>
chip_gen: v7x
topology: tpu7x:2x2x1
jax: 0.10.0
libtpu: 0.0.40
codegen_flags: <defaults>
</compile_context>

<pallas_src>
import math
import functools

import jax
import jax.numpy as jnp
from jax.experimental import pallas as pl
from jax.experimental.pallas import tpu as pltpu

DIM_MODEL = 32
MAX_LEN = 20000
DROPOUT_RATE = 0.1
_LANE = 128


def _cdiv(a, b):
    return -(-a // b)


def _rows_per_tile():
    """Rows (of 128 f32 lanes) per block, chosen per TPU generation."""
    try:
        kind = jax.devices()[0].device_kind.lower()
    except Exception:
        return 2048
    if "v6" in kind or "v7" in kind:
        return 4096   # 2 MiB blocks; ~12 MiB double-buffered, fits scoped VMEM defaults
    return 2048       # 1 MiB blocks; safe on v5e's 16 MiB scoped-VMEM default


def make_pos_enc(dim_model, max_len=MAX_LEN):
    """Replicates the buffer built in PositionalEncoding.__init__ (shape (max_len, dim)).

    NOTE: matches the PyTorch spec exactly, including its -log(20000.0) frequency
    base (the module uses that constant, not the canonical 10000).
    """
    position = jnp.arange(max_len, dtype=jnp.float32)[:, None]              # (max_len, 1)
    div_term = jnp.exp(
        jnp.arange(0, dim_model, 2, dtype=jnp.float32) * (-math.log(20000.0) / dim_model)
    )                                                                        # (dim/2,)
    ang = position * div_term                                                # (max_len, dim/2)
    pe = jnp.zeros((max_len, dim_model), jnp.float32)
    pe = pe.at[:, 0::2].set(jnp.sin(ang))
    pe = pe.at[:, 1::2].set(jnp.cos(ang))
    return pe


def _pe_add_kernel(seed_ref, x_ref, pe_ref, o_ref, *, rate, training):
    """o = dropout(x) + pe   (f32 accumulate, downcast on store)."""
    x = x_ref[...].astype(jnp.float32)
    if training and rate > 0.0:
        # Unique, odd-constant-mixed PRNG stream per (tile, batch) grid point.
        pltpu.prng_seed(
            seed_ref[0]
            + pl.program_id(0) * jnp.int32(1013904223)
            + pl.program_id(1) * jnp.int32(1664525)
        )
        bits = pltpu.bitcast(pltpu.prng_random_bits(x.shape), jnp.uint32)
        # P(bits < thresh) = rate; clamp guards rate ~ 1.0 uint32 overflow.
        thresh = jnp.uint32(min(int(rate * (2 ** 32)), 2 ** 32 - 1))
        inv_keep = 1.0 / (1.0 - rate)                        # hoisted Python constant
        # Single select folds keep-mask and 1/(1-p) scale (inverted dropout).
        x = jnp.where(bits >= thresh, x * inv_keep, 0.0)
    o_ref[...] = (x + pe_ref[...]).astype(o_ref.dtype)


class PositionalEncoding:
    """JAX/Pallas port of the PyTorch PositionalEncoding forward pass."""

    def __init__(self, dim_model, dropout=DROPOUT_RATE, max_len=MAX_LEN):
        if not (0.0 <= float(dropout) < 1.0):
            raise ValueError("dropout rate must be in [0, 1)")
        self.dim_model = dim_model
        self.rate = float(dropout)
        self.max_len = max_len
        self.pos_enc = make_pos_enc(dim_model, max_len)          # (max_len, d) f32
        # Lane-dense f32 slab, built once: row-major flatten of pos_enc -> (max_rows, 128).
        total = max_len * dim_model
        max_rows = _cdiv(total, _LANE)
        flat = self.pos_enc.reshape(total)
        if max_rows * _LANE != total:
            flat = jnp.pad(flat, (0, max_rows * _LANE - total))
        self.pe_slab = flat.reshape(max_rows, _LANE)

    def __call__(self, x, seq_pos=None, *, training=False, seed=0):
        if x.ndim == 3:
            return self._forward_3d(x, training, seed)
        if x.ndim == 2:
            if seq_pos is None:
                raise ValueError("seq_pos required for 2D (recurrent) input")
            return self._forward_2d(x, seq_pos, training, seed)
        raise ValueError(f"unsupported rank {x.ndim}")

    # ---- main (b, n, d) path: Pallas kernel ----
    def _forward_3d(self, x, training, seed):
        b, n, d = x.shape
        assert d == self.dim_model and n <= self.max_len
        total = n * d
        rows = _cdiv(total, _LANE)

        # Lane-dense view of the activation; free (pure reshape) when n*d % 128 == 0.
        x_flat = x.reshape(b, total)
        lane_pad = rows * _LANE - total
        if lane_pad:
            # TODO(synk): rare fallback (n*d not a multiple of 128) costs one extra
            # HBM pad pass + output slice; the common path is copy-free.
            x_flat = jnp.pad(x_flat, ((0, 0), (0, lane_pad)))
        x_t = x_flat.reshape(b, rows, _LANE)

        tr_cap = _rows_per_tile()
        if rows < 8:
            # Tiny sequence: one full-extent block; slice the cached slab so the
            # PE block shape equals its full array dims (sublane rule).
            tr, grid_t = rows, 1
            pe_arg = self.pe_slab[:rows]
        else:
            # Balanced tiles, multiple of 8 sublanes, ~tr_cap rows each.  The PE
            # slab is passed whole and indexed by BlockSpec (no per-call slice /
            # pad).  A non-dividing final tile is handled by Pallas' partial-block
            # masking, so x is never padded along rows.
            n_tiles = _cdiv(rows, tr_cap)
            tr = _cdiv(_cdiv(rows, n_tiles), 8) * 8
            grid_t = _cdiv(rows, tr)
            pe_arg = self.pe_slab

        seed_arr = jnp.asarray([seed], dtype=jnp.int32)
        kern = functools.partial(_pe_add_kernel, rate=self.rate, training=training)

        out = pl.pallas_call(
            kern,
            out_shape=jax.ShapeDtypeStruct((b, rows, _LANE), x.dtype),
            grid_spec=pltpu.PrefetchScalarGridSpec(
                num_scalar_prefetch=1,
                # batch innermost => the PE block index (t, 0) is constant over the
                # inner loop, keeping the PE tile VMEM-resident instead of being
                # re-DMA'd once per batch element.
                grid=(grid_t, b),
                in_specs=[
                    pl.BlockSpec((1, tr, _LANE), lambda t, i, seed: (i, t, 0)),   # x
                    pl.BlockSpec((tr, _LANE), lambda t, i, seed: (t, 0)),         # pe (shared over batch)
                ],
                out_specs=pl.BlockSpec((1, tr, _LANE), lambda t, i, seed: (i, t, 0)),
            ),
            compiler_params=pltpu.CompilerParams(
                dimension_semantics=("parallel", "parallel"),
            ),
        )(seed_arr, x_t, pe_arg)

        if lane_pad:
            return out.reshape(b, rows * _LANE)[:, :total].reshape(b, n, d)
        return out.reshape(b, n, d)

    # ---- tiny (b, d) decode path: plain JAX per perf review ----
    def _forward_2d(self, x, seq_pos, training, seed):
        # A pallas_call on a (b, 32) tensor pays ~1 us fixed cost and masked
        # 32-of-128-lane stores; a fused XLA add is strictly cheaper here.
        pe = self.pos_enc[seq_pos][None]                      # (1, d) f32
        xf = x.astype(jnp.float32)
        if training and self.rate > 0.0:
            keep = jax.random.bernoulli(jax.random.PRNGKey(seed), 1.0 - self.rate, x.shape)
            xf = jnp.where(keep, xf / (1.0 - self.rate), 0.0)
        return (xf + pe).astype(x.dtype)


if __name__ == "__main__":
    key = jax.random.PRNGKey(0)
    k3, k2 = jax.random.split(key)

    batch, seq, dim = 2, 8, DIM_MODEL
    pe_mod = PositionalEncoding(dim)

    # --- 3D case: (b, n, d) ---
    x3 = jax.random.normal(k3, (batch, seq, dim), dtype=jnp.float32)
    out3 = jax.block_until_ready(pe_mod(x3, training=False))
    ref3 = x3 + pe_mod.pos_enc[None, :seq, :]                 # eval mode: dropout is identity
    assert out3.shape == (batch, seq, dim)
    assert jnp.allclose(out3, ref3, atol=1e-6), "3D mismatch"

    # --- 2D recurrent case: (b, d) with seq_pos ---
    seq_pos = 5
    x2 = jax.random.normal(k2, (batch, dim), dtype=jnp.float32)
    out2 = jax.block_until_ready(pe_mod(x2, seq_pos=seq_pos, training=False))
    ref2 = x2 + pe_mod.pos_enc[None, seq_pos, :]
    assert out2.shape == (batch, dim)
    assert jnp.allclose(out2, ref2, atol=1e-6), "2D mismatch"

    # --- training-mode smoke test (TPU hardware PRNG) ---
    # TODO(synk): pltpu.prng_seed / prng_random_bits only lower on the real Mosaic
    # TPU backend (no CPU/interpret rule), so this path is exercised only when the
    # default backend is TPU.  PyTorch dropout RNG cannot be bit-matched anyway;
    # semantics are identical (inverted dropout, p=0.1).
    if jax.default_backend() == "tpu":
        out3_tr = jax.block_until_ready(pe_mod(x3, training=True, seed=123))
        assert out3_tr.shape == (batch, seq, dim)

    print("KERNEL_OK")
</pallas_src>

<mosaic_0001>
module attributes {stable_mosaic.version = 11 : i64} {
  func.func @_pe_add_kernel(%arg0: i32, %arg1: i32, %arg2: memref<1xi32, #tpu.memory_space<smem>>, %arg3: memref<1x2x128xf32, #tpu.memory_space<vmem>>, %arg4: memref<2x128xf32, #tpu.memory_space<vmem>>, %arg5: memref<1x2x128xf32, #tpu.memory_space<vmem>>) attributes {dimension_semantics = [#tpu.dimension_semantics<parallel>, #tpu.dimension_semantics<parallel>], iteration_bounds = array<i64: 1, 2>, scalar_prefetch = 1 : i64, scratch_operands = 0 : i64, tpu.core_type = #tpu.core_type<tc>, window_params = [{transform_indices = @transform_0, window_bounds = array<i64: 1, 2, 128>}, {transform_indices = @transform_1, window_bounds = array<i64: 2, 128>}, {transform_indices = @transform_2, window_bounds = array<i64: 1, 2, 128>}]} {
    %c0 = arith.constant 0 : index
    %c0_0 = arith.constant 0 : index
    %c0_1 = arith.constant 0 : index
    %0 = vector.load %arg3[%c0, %c0_0, %c0_1] : memref<1x2x128xf32, #tpu.memory_space<vmem>>, vector<1x2x128xf32>
    %c0_2 = arith.constant 0 : index
    %c0_3 = arith.constant 0 : index
    %1 = vector.load %arg4[%c0_2, %c0_3] : memref<2x128xf32, #tpu.memory_space<vmem>>, vector<2x128xf32>
    %2 = vector.shape_cast %1 : vector<2x128xf32> to vector<1x2x128xf32>
    %3 = arith.addf %0, %2 : vector<1x2x128xf32>
    %c0_4 = arith.constant 0 : index
    %c0_5 = arith.constant 0 : index
    %c0_6 = arith.constant 0 : index
    %4 = vector.load %arg5[%c0_4, %c0_5, %c0_6] : memref<1x2x128xf32, #tpu.memory_space<vmem>>, vector<1x2x128xf32>
    tpu.vector_store %arg5[%c0_4, %c0_5, %c0_6], %3 {strides = array<i32>} : memref<1x2x128xf32, #tpu.memory_space<vmem>>, vector<1x2x128xf32>,
    return
  }
  func.func @transform_0(%arg0: i32, %arg1: i32, %arg2: memref<1xi32, #tpu.memory_space<smem>>) -> (i32, i32, i32) {
    %c0_i32 = arith.constant 0 : i32
    %c0_i32_0 = arith.constant 0 : i32
    return %arg1, %arg0, %c0_i32 : i32, i32, i32
  }
  func.func @transform_1(%arg0: i32, %arg1: i32, %arg2: memref<1xi32, #tpu.memory_space<smem>>) -> (i32, i32) {
    %c0_i32 = arith.constant 0 : i32
    %c0_i32_0 = arith.constant 0 : i32
    return %arg0, %c0_i32 : i32, i32
  }
  func.func @transform_2(%arg0: i32, %arg1: i32, %arg2: memref<1xi32, #tpu.memory_space<smem>>) -> (i32, i32, i32) {
    %c0_i32 = arith.constant 0 : i32
    %c0_i32_0 = arith.constant 0 : i32
    return %arg1, %arg0, %c0_i32 : i32, i32, i32
  }
}

</mosaic_0001>

<bundles_post_ra>
// kernel: tpu_custom_call.1
= control target key start
LH: loop header
LB: loop body
LE: loop exit
PB: predicated region body
PF: predicated region fallthrough
CT: control target
= control target key end

     0   :  { %9 = vsyncpa [#allocation5], 0  ;;  %s696_s0 = inlined_call_operand.<no memory space> [shape: s32[1], index: 0, kind: input, shape index: {}]   ;;  %s697_s1 = inlined_call_operand.hbm [shape: f32[2,2,128], index: 1, kind: input, shape index: {}]   ;;  %s698_s2 = inlined_call_operand.vmem [shape: f32[2,128], index: 2, kind: input, shape index: {}]   ;;  %s699_s3 = inlined_call_operand.hbm [shape: f32[2,2,128], index: 3, kind: output, shape index: {}]  }
   0x1   :  { %11 = vsyncpa [#allocation5 + $0x1], 0 }
   0x2   :  { %12 = vsyncpa [#allocation6], 0 }
   0x3   :  { %14 = vsyncpa [#allocation6 + $0x1], 0  ;;  %s521_s12 = smov 0   ;;  %s523_s13 = smov 0  }
   0x4   :  { %s525_s14 = smov 0   ;;  %s527_s0 = smov 0  }
   0x5   :  { %s529_s15 = smov 0   ;;  %s531_s16 = smov 0  }
   0x6 LB: > { %s309_s17 = sadd.s32 4294967295, %s497_s16   ;;  %s310_s18 = sadd.s32 4294967294, %s497_s16   ;;  %s497_s16 = sphi %s531_s16, %s20_s16   ;;  %s493_s15 = sphi %s529_s15, %s715_s15   ;;  %s489_s0 = sphi %s527_s0, %s714_s0   ;;  %s485_s14 = sphi %s525_s14, %s713_s14   ;;  %s481_s13 = sphi %s523_s13, %s712_s13   ;;  %s477_s12 = sphi %s521_s12, %s711_s12  }
   0x7   : > { %s29_s19 = sadd.s32 1, %s493_s15  ;;  %s41_s20 = sadd.s32 1, %s485_s14 }
   0x8   : > { %p30_p0 = scmp.ge.s32.totalorder %s29_s19, 2  ;;  %p48_p1 = scmp.ne.s32.totalorder %s485_s14, %s481_s13 }
   0x9   : > { %p49_p2 = scmp.eq.s32.totalorder %s497_s16, 0  ;;  %p54_p3 = scmp.ne.s32.totalorder %s481_s13, %s477_s12 }
   0xa   : > { %s717_s19 = smov (%p30_p0, %s29_s19), 0  ;;  %p55_p5 = scmp.eq.s32.totalorder %s309_s17, 0 }
   0xb   : > { %p562_p4 = por %p49_p2, %p48_p1  ;;  %s36_s22 = ssub.s32 %s493_s15, %s717_s19 }
   0xc   : > { %p106_p6 = scmp.eq.s32.totalorder %s309_s17, 1  ;;  %p39_p7 = scmp.eq.s32.totalorder %s36_s22, 0 }
   0xd   : > { %p568_p8 = por %p55_p5, %p54_p3  ;;  %p112_p10 = scmp.eq.s32.totalorder %s310_s18, 1 }
   0xe   : > { %p572_p9 = por %p106_p6, %p48_p1  ;;  %p335_p13 = scmp.lt.s32.totalorder %s497_s16, 2 }
   0xf   : > { %s577_s25 = scalar_select %p39_p7, %s485_s14, %s41_s20  }
  0x10   : > { %s703_s24 = scalar_select %p572_p9, 1, 0 }
  0x11   : > { %p579_p11 = por %p112_p10, %p54_p3  ;;  %s139_s27 = sand.u32 1, %s485_s14  }
  0x12   : > { %s314_s28 = sshll.u32 %s139_s27, 1  ;;  %s315_s29 = sshll.u32 %s493_s15, 5 }
  0x13   : > { %s704_s26 = scalar_select %p579_p11, 1, 0 }
  0x14   : > { %s590_s5 = scalar_lea.hbm %s697_s1, %s315_s29  ;;  %s143_s6 = scalar_lea.vmem [#allocation4], %s314_s28 }
  0x15   : > { %s151_s7 = sshll.u32 %s143_s6, 4  ;;  %p596_p0 = pnand %p335_p13, %p562_p4  ;;  %s592_s7 = int_to_ptr.vmem [resolvable:$true] %s151_s7 }
  0x16   : > { %s140_s9 = scalar_lea.sflag [#allocation5], %s139_s27  ;;  %s385_s10 = scalar_lea.hbm %s590_s5, 32 }
  0x17   : > { %p386_p3 = scmp.ne.s32.totalorder %s590_s5, %s385_s10  ;;  %p387_p5 = pneg %p596_p0 }
  0x18   : > { %s390_s18 = scalar_lea.hbm %s697_s1, 64  ;;  %p391_p4 = scmp.lt.u32.totalorder %s590_s5, %s697_s1 }
  0x19   : > { %p388_p6 = pnand %p387_p5, %p386_p3  ;;  %p392_p10 = scmp.lt.u32.totalorder %s390_s18, %s385_s10 }
  0x1a   : > { %p394_p12 = scmp.lt.u32.totalorder %s385_s10, %s590_s5 }
  0x1b   : > { %p389_p7 = pneg %p388_p6  ;;  %p393_p13 = por %p392_p10, %p391_p4 }
  0x1d   : > { %p395_p1 = por %p394_p12, %p393_p13 }
  0x1f   : > { %p396_p2 = pnand %p395_p1, %p389_p7 }
  0x21   : > { %399 = shalt.err (!%p396_p2)
}
  0x22   : > { %s400_s22 = scalar_lea.vmem %s592_s7, 32  ;;  %s499_s27 = smov [#allocation4]  }
  0x23   : > { %p401_p3 = scmp.ne.s32.totalorder %s592_s7, %s400_s22  ;;  %s405_s28 = sshll.u32 %s499_s27, 4  ;;  %s406_s28 = int_to_ptr.vmem [resolvable:$false] %s405_s28 }
  0x24   : > { %s407_s29 = scalar_lea.vmem %s406_s28, 64  ;;  %p408_p9 = scmp.lt.s32.totalorder %s592_s7, %s406_s28 }
  0x25   : > { %p403_p6 = pnand %p401_p3, %p387_p5  ;;  %p409_p4 = scmp.lt.s32.totalorder %s407_s29, %s400_s22 }
  0x27   : > { %p404_p11 = pneg %p403_p6  ;;  %p410_p10 = por %p409_p4, %p408_p9 }
  0x29   : > { %p411_p12 = pnand %p410_p10, %p404_p11 }
  0x2b   : > { %414 = shalt.err (!%p411_p12)
}
  0x2c   : > { %330 = dma.hbm_to_vmem [thread:$0]  (!%p596_p0), %s590_s5, 32, %s592_s7, %s140_s9  }
  0x2d   : > { %p706_p1 = scmp.lt.s32.totalorder %s497_s16, 3  ;;  %p707_p2 = scmp.ge.s32.totalorder %s497_s16, 1 }
  0x2f   : > { %p157_p5 = pnand %p707_p2, %p706_p1 }
  0x30   : > { %s632_s30 = sand.u32 (!%p157_p5), 1, %s481_s13  }
  0x31   : > { %160 = sbr.rel (%p157_p5) target bundleno = 83 (0x53), region = 28  ;;  %s317_s4 = sshll.u32 (!%p157_p5), %s632_s30, 1 }
  0x32   : > { %s163_s6 = scalar_lea.sflag (!%p157_p5), [#allocation5], %s632_s30  ;;  %s166_s10 = scalar_lea.vmem (!%p157_p5), [#allocation4], %s317_s4 }
  0x38   : > { %468 = dma.done.wait (%p568_p8), %s163_s6, 32  }
  0x39   : > { %470 = vsyncadd (%p568_p8), %s163_s6, 4294967264  ;;  %s190_s5 = scalar_lea.vmem [#allocation7], %s317_s4  ;;  %s320_s8 = sshll.u32 %s489_s0, 5  ;;  %v195_v0 = vld [vmem:[%s166_s10] sm:$0x3] }
  0x3a   : > { %s214_s7 = sshll.u32 %s190_s5, 4  ;;  %v196_v1 = vld [vmem:[%s698_s2] sm:$0x3]  ;;  %s649_s23 = scalar_lea.hbm %s699_s3, %s320_s8  ;;  %s644_s7 = int_to_ptr.vmem [resolvable:$true] %s214_s7 }
  0x3b   : > { %v197_v2 = vadd.f32 %v196_v1, %v195_v0  ;;  %s200_s20 = scalar_lea.sflag [#allocation6], %s632_s30  ;;  %s415_s21 = scalar_lea.vmem %s644_s7, 32 }
  0x3c   : > { %p416_p8 = scmp.ne.s32.totalorder %s644_s7, %s415_s21  ;;  %p708_p9 = scmp.ne.s32.totalorder %s703_s24, 0 }
  0x3d   : > { %198 = vst [vmem:[%s190_s5] sm:$0x3] %v197_v2  ;;  %s500_s0 = smov [#allocation7]  }
  0x3e   : > { %p417_p11 = pnand %p416_p8, %p708_p9  ;;  %s419_s22 = sshll.u32 %s500_s0, 4  ;;  %s420_s22 = int_to_ptr.vmem [resolvable:$false] %s419_s22 }
  0x3f   : > { %s421_s27 = scalar_lea.vmem %s420_s22, 64  ;;  %p422_p7 = scmp.lt.s32.totalorder %s644_s7, %s420_s22 }
  0x40   : > { %p418_p0 = pneg %p417_p11  ;;  %p423_p13 = scmp.lt.s32.totalorder %s421_s27, %s415_s21 }
  0x42   : > { %p424_p3 = por %p423_p13, %p422_p7 }
  0x44   : > { %p425_p6 = pnand %p424_p3, %p418_p0 }
  0x46   : > { %428 = shalt.err (!%p425_p6)
}
  0x47   : > { %s429_s28 = scalar_lea.hbm %s649_s23, 32  ;;  %s433_s4 = scalar_lea.hbm %s699_s3, 64 }
  0x48   : > { %p430_p4 = scmp.ne.s32.totalorder %s649_s23, %s429_s28  ;;  %p434_p1 = scmp.lt.u32.totalorder %s649_s23, %s699_s3 }
  0x49   : > { %p435_p2 = scmp.lt.u32.totalorder %s433_s4, %s429_s28  ;;  %p437_p8 = scmp.lt.u32.totalorder %s429_s28, %s649_s23 }
  0x4a   : > { %p431_p10 = pnand %p430_p4, %p708_p9 }
  0x4b   : > { %p436_p5 = por %p435_p2, %p434_p1 }
  0x4c   : > { %p432_p12 = pneg %p431_p10 }
  0x4d   : > { %p438_p11 = por %p437_p8, %p436_p5 }
  0x4f   : > { %p439_p0 = pnand %p438_p11, %p432_p12 }
  0x51   : > { %442 = shalt.err (!%p439_p0)
}
  0x52   : > { %325 = dma.vmem_to_hbm [thread:$0]  (%p708_p9), %s644_s7, 32, %s649_s23, %s200_s20  }
  0x53 PF: > { %s226_s5 = sand.u32 1, %s477_s12   ;;  %p709_p7 = scmp.ne.s32.totalorder %s704_s26, 0 }
  0x54   : > { %p710_p13 = scmp.ge.s32.totalorder %s497_s16, 2  ;;  %s227_s8 = scalar_lea.sflag [#allocation6], %s226_s5 }
  0x56   : > { %p332_p3 = pnand %p710_p13, %p709_p7 }
  0x58   : > { %472 = dma.done.wait (!%p332_p3), %s227_s8, 32  }
  0x59   : > { %474 = vsyncadd (!%p332_p3), %s227_s8, 4294967264  ;;  %s20_s16 = sadd.s32 1, %s497_s16   ;;  %s711_s12 = smov %s481_s13 }
  0x5a   : > { %p17_p6 = scmp.ge.s32.totalorder %s20_s16, 4   ;;  %s712_s13 = smov %s485_s14 }
  0x5b   : > { %s713_s14 = smov %s577_s25  ;;  %s714_s0 = smov %s493_s15 }
  0x5c   : > { %s715_s15 = smov %s717_s19  ;;  %19 = sbr.rel (!%p17_p6) target bundleno = 6 (0x6), region = 76 }
  0x63   :  { %232 = vsyncpa [#allocation5], 1 }
  0x64   :  { %234 = vsyncpa [#allocation5 + $0x1], 1 }
  0x65   :  { %235 = vsyncpa [#allocation6], 1 }
  0x66   :  { %237 = vsyncpa [#allocation6 + $0x1], 1 }

</bundles_post_ra>
